<compile_context>
chip_gen: v7x
topology: tpu7x:2x2x1
jax: 0.10.0
libtpu: 0.0.40
codegen_flags: <defaults>
</compile_context>

<pallas_src>
import functools

import jax
import jax.numpy as jnp
from jax.experimental import pallas as pl
from jax.experimental.pallas import tpu as pltpu


def _sa_loss_kernel(x_ref, out_ref):
    # x_ref  : (Bt, 3, HW) tile in VMEM (native dtype, upcast in-register)
    # out_ref: (1, Bt, 1)  per-image spatial mean of k
    x = x_ref[...].astype(jnp.float32)
    _, _, hw = x_ref.shape
    inv_hw = 1.0 / float(hw)

    # Per-image, per-channel spatial mean (lane reduction).
    mean_c = jnp.sum(x, axis=-1, keepdims=True) * inv_hw      # (Bt, 3, 1)
    d = x - mean_c                                            # (Bt, 3, HW)

    # k = sqrt(Dr^2 + Dg^2 + Db^2): tiny 3-element cross-sublane reduce.
    k = jnp.sqrt(jnp.sum(d * d, axis=1))                      # (Bt, HW)

    # Per-image spatial mean of k.
    out_ref[0] = jnp.sum(k, axis=-1, keepdims=True) * inv_hw  # (Bt, 1)


@functools.partial(jax.jit, static_argnames=("block_budget_bytes",))
def sa_loss(x, *, block_budget_bytes=2 * 1024 * 1024):
    """Forward pass of Sa_Loss. x: (B, 3, H, W), float32 or bf16, NCHW."""
    B, C, H, W = x.shape
    if C != 3:
        raise ValueError("Sa_Loss requires exactly 3 channels (r, g, b).")
    HW = H * W

    # Free layout change: lane-dense spatial axis.
    xf = x.reshape(B, C, HW)

    # Pick how many whole images per grid step (~2 MiB input block).
    bytes_per_image = C * HW * x.dtype.itemsize
    bt = max(1, min(B, block_budget_bytes // max(bytes_per_image, 1)))
    while B % bt != 0:
        bt -= 1
    nb = B // bt

    per_image = pl.pallas_call(
        _sa_loss_kernel,
        out_shape=jax.ShapeDtypeStruct((nb, bt, 1), jnp.float32),
        grid=(nb,),
        in_specs=[pl.BlockSpec((bt, C, HW), lambda g: (g, 0, 0))],
        out_specs=pl.BlockSpec((1, bt, 1), lambda g: (g, 0, 0)),
        compiler_params=pltpu.CompilerParams(
            dimension_semantics=("parallel",)),
        cost_estimate=pl.CostEstimate(
            flops=8 * B * C * HW,
            transcendentals=B * HW,            # sqrt via EUP-ish path
            bytes_accessed=B * C * HW * x.dtype.itemsize + B * 4),
    )(xf)

    # torch.mean(k) over (B, 1, H, W) == mean over per-image spatial means.
    return jnp.mean(per_image.reshape(B))


def _sa_loss_ref(x):
    """Pure-JAX reference mirroring the PyTorch module."""
    xf = x.astype(jnp.float32)
    mean_rgb = jnp.mean(xf, axis=(2, 3), keepdims=True)
    d = xf - mean_rgb
    k = jnp.sqrt(jnp.sum(d * d, axis=1))
    return jnp.mean(k)


if __name__ == "__main__":
    key = jax.random.PRNGKey(0)
    B, C, H, W = 2, 3, 16, 16
    x = jax.random.uniform(key, (B, C, H, W), dtype=jnp.float32)

    loss = sa_loss(x)
    jax.block_until_ready(loss)

    ref = _sa_loss_ref(x)
    assert jnp.allclose(loss, ref, rtol=1e-4, atol=1e-4), (loss, ref)

    print("KERNEL_OK")
</pallas_src>

<mosaic_0001>
module attributes {stable_mosaic.version = 11 : i64} {
  func.func @_sa_loss_kernel(%arg0: i32, %arg1: memref<2x3x256xf32, #tpu.memory_space<vmem>>, %arg2: memref<1x2x1xf32, #tpu.memory_space<vmem>>) attributes {dimension_semantics = [#tpu.dimension_semantics<parallel>], iteration_bounds = array<i64: 1>, scalar_prefetch = 0 : i64, scratch_operands = 0 : i64, tpu.core_type = #tpu.core_type<tc>, window_params = [{transform_indices = @transform_0, window_bounds = array<i64: 2, 3, 256>}, {transform_indices = @transform_1, window_bounds = array<i64: 1, 2, 1>}]} {
    %c0 = arith.constant 0 : index
    %c0_0 = arith.constant 0 : index
    %c0_1 = arith.constant 0 : index
    %0 = vector.load %arg1[%c0, %c0_0, %c0_1] : memref<2x3x256xf32, #tpu.memory_space<vmem>>, vector<2x3x256xf32>
    %cst = arith.constant dense<0.000000e+00> : vector<2x3xf32>
    %1 = vector.multi_reduction <add>, %0, %cst [2] : vector<2x3x256xf32> to vector<2x3xf32>
    %2 = vector.shape_cast %1 : vector<2x3xf32> to vector<2x3x1xf32>
    %cst_2 = arith.constant 3.906250e-03 : f32
    %3 = vector.broadcast %cst_2 : f32 to vector<2x3x1xf32>
    %4 = arith.mulf %2, %3 : vector<2x3x1xf32>
    %5 = vector.broadcast %4 : vector<2x3x1xf32> to vector<2x3x256xf32>
    %6 = arith.subf %0, %5 : vector<2x3x256xf32>
    %7 = arith.mulf %6, %6 : vector<2x3x256xf32>
    %cst_3 = arith.constant dense<0.000000e+00> : vector<2x256xf32>
    %8 = vector.multi_reduction <add>, %7, %cst_3 [1] : vector<2x3x256xf32> to vector<2x256xf32>
    %9 = math.sqrt %8 : vector<2x256xf32>
    %cst_4 = arith.constant dense<0.000000e+00> : vector<2xf32>
    %10 = vector.multi_reduction <add>, %9, %cst_4 [1] : vector<2x256xf32> to vector<2xf32>
    %11 = vector.shape_cast %10 : vector<2xf32> to vector<2x1xf32>
    %cst_5 = arith.constant 3.906250e-03 : f32
    %12 = vector.broadcast %cst_5 : f32 to vector<2x1xf32>
    %13 = arith.mulf %11, %12 : vector<2x1xf32>
    %c0_6 = arith.constant 0 : index
    %c0_7 = arith.constant 0 : index
    %c0_8 = arith.constant 0 : index
    %14 = vector.load %arg2[%c0_6, %c0_7, %c0_8] : memref<1x2x1xf32, #tpu.memory_space<vmem>>, vector<1x2x1xf32>
    %15 = vector.shape_cast %14 : vector<1x2x1xf32> to vector<2x1xf32>
    %16 = vector.shape_cast %13 : vector<2x1xf32> to vector<1x2x1xf32>
    tpu.vector_store %arg2[%c0_6, %c0_7, %c0_8], %16 {strides = array<i32>} : memref<1x2x1xf32, #tpu.memory_space<vmem>>, vector<1x2x1xf32>,
    return
  }
  func.func @transform_0(%arg0: i32) -> (i32, i32, i32) {
    %c0_i32 = arith.constant 0 : i32
    %c0_i32_0 = arith.constant 0 : i32
    %c0_i32_1 = arith.constant 0 : i32
    return %arg0, %c0_i32, %c0_i32_0 : i32, i32, i32
  }
  func.func @transform_1(%arg0: i32) -> (i32, i32, i32) {
    %c0_i32 = arith.constant 0 : i32
    %c0_i32_0 = arith.constant 0 : i32
    %c0_i32_1 = arith.constant 0 : i32
    return %arg0, %c0_i32, %c0_i32_0 : i32, i32, i32
  }
}

</mosaic_0001>

<bundles_post_ra>
// kernel: sa_loss.1
= control target key start
LH: loop header
LB: loop body
LE: loop exit
PB: predicated region body
PF: predicated region fallthrough
CT: control target
= control target key end

     0   :  { %vm16_vm0 = vcmask 1042432   ;;  %v146_v10 = vmov 839922192   ;;  %v34_v12 = vlaneseq  ;;  %vm117_vm2 = vcmask 1041409   ;;  %s178_s0 = inlined_call_operand.vmem [shape: f32[2,3,256], index: 0, kind: input, shape index: {}]   ;;  %s179_s1 = inlined_call_operand.vmem [shape: f32[1,2,1], index: 1, kind: output, shape index: {}]  }
   0x1   :  { %v8_v0 = vld [vmem:[%s178_s0] sm:$0x77]  ;;  %v9_v1 = vld [vmem:[%s178_s0 + $0x8] sm:$0x77]  ;;  %v32_v11 = vunpack.c.l.s4 %v146_v10  ;;  %vm122_vm3 = vcmask 1041408   ;;  %vm129_vm11 = vcmask 1024  }
   0x2   :  { %v12_v2 = vcombine.high %v8_v0, %v8_v0  ;;  %v17_v3 = vsel %vm16_vm0, %v8_v0, 0.0  ;;  %v13_v4 = vcombine.high %v9_v1, %v9_v1  ;;  %v22_v6 = vsel %vm16_vm0, %v9_v1, 0.0 }
   0x3   :  { %v33_v13 = vunpack.c.0.s8 %v32_v11  ;;  %v35_v14 = vshrl.u32 %v34_v12, 7 }
   0x4   :  { %v18_v5 = vsel %vm16_vm0, %v12_v2, 0.0  ;;  %v23_v7 = vsel %vm16_vm0, %v13_v4, 0.0 }
   0x5   :  { %v19_v8 = vadd.f32 %v18_v5, %v17_v3  ;;  %v24_v9 = vadd.f32 %v23_v7, %v22_v6  ;;  %v36_v15 = vsub.s32 %v33_v13, %v35_v14 }
   0x7   :  { %20 = vadd.xlane.f32.xlu0 %v19_v8 }
   0xb   :  { %25 = vadd.xlane.f32.xlu0 %v24_v9 }
  0x94   :  { %v21_v16 = vpop.xlane.xlu0 %20 }
  0x95   :  { %v27_v17 = vmul.f32 0.00390625, %v21_v16 }
  0x97   :  { %v37_v18 = vrot.slane %v27_v17, %v36_v15 }
  0x98   :  { %v26_v19 = vpop.xlane.xlu0 %25 }
  0x99   :  { %v47_v20 = vsub.f32 %v8_v0, %v37_v18  ;;  %v28_v21 = vmul.f32 0.00390625, %v26_v19 }
  0x9b   :  { %v49_v22 = vmul.f32 %v47_v20, %v47_v20  ;;  %v44_v23 = vrot.slane %v28_v21, %v36_v15 }
  0x9d   :  { %v53_v24 = vcombine.high %v49_v22, %v49_v22  ;;  %v57_v25 = vsel %vm16_vm0, %v49_v22, 0.0  ;;  %v48_v26 = vsub.f32 %v9_v1, %v44_v23 }
  0x9e   :  { %v58_v27 = vrot.slane %v57_v25, 4 }
  0x9f   :  { %v64_v28 = vsel %vm16_vm0, %v53_v24, 0.0  ;;  %v50_v29 = vmul.f32 %v48_v26, %v48_v26 }
  0xa0   :  { %v59_v30 = vadd.f32 %v58_v27, %v57_v25  ;;  %v65_v31 = vrot.slane %v64_v28, 4 }
  0xa1   :  { %v54_v32 = vcombine.high %v50_v29, %v50_v29  ;;  %v71_v33 = vsel %vm16_vm0, %v50_v29, 0.0 }
  0xa2   :  { %v60_v34 = vrot.slane %v59_v30, 2  ;;  %v66_v35 = vadd.f32 %v65_v31, %v64_v28  ;;  %v72_v36 = vrot.slane %v71_v33, 4 }
  0xa3   :  { %v78_v37 = vsel %vm16_vm0, %v54_v32, 0.0 }
  0xa4   :  { %v61_v38 = vadd.f32 %v60_v34, %v59_v30  ;;  %v67_v39 = vrot.slane %v66_v35, 2  ;;  %v73_v40 = vadd.f32 %v72_v36, %v71_v33  ;;  %v79_v41 = vrot.slane %v78_v37, 4 }
  0xa6   :  { %v62_v42 = vrot.slane %v61_v38, 1  ;;  %v68_v43 = vadd.f32 %v67_v39, %v66_v35  ;;  %v74_v44 = vrot.slane %v73_v40, 2  ;;  %v80_v45 = vadd.f32 %v79_v41, %v78_v37 }
  0xa8   :  { %v63_v46 = vadd.f32 %v62_v42, %v61_v38  ;;  %v69_v47 = vrot.slane %v68_v43, 1  ;;  %v75_v48 = vadd.f32 %v74_v44, %v73_v40  ;;  %v81_v49 = vrot.slane %v80_v45, 2 }
  0xaa   :  { %v70_v50 = vadd.f32 %v69_v47, %v68_v43  ;;  %v76_v51 = vrot.slane %v75_v48, 1  ;;  %v82_v52 = vadd.f32 %v81_v49, %v80_v45  ;;  %138 = vrsqrt.f32 %v63_v46 }
  0xab   :  { %vm87_vm1 = vcmp.eq.f32.partialorder %v63_v46, inf  ;;  %vm89_vm4 = vcmp.eq.f32.partialorder %v63_v46, 0.0  ;;  %v90_v62 = vand.u32 2147483648, %v63_v46 }
  0xac   :  { %v77_v53 = vadd.f32 %v76_v51, %v75_v48  ;;  %v83_v54 = vrot.slane %v82_v52, 1  ;;  %140 = vrsqrt.f32 %v70_v50  ;;  %vm94_vm5 = vcmp.eq.f32.partialorder %v70_v50, inf }
  0xad   :  { %v97_v1 = vand.u32 2147483648, %v70_v50  ;;  %vm96_vm9 = vcmp.eq.f32.partialorder %v70_v50, 0.0 }
  0xae   :  { %v84_v55 = vadd.f32 %v83_v54, %v82_v52  ;;  %142 = vrsqrt.f32 %v77_v53  ;;  %vm101_vm6 = vcmp.eq.f32.partialorder %v77_v53, inf  ;;  %v104_v2 = vand.u32 2147483648, %v77_v53 }
  0xaf   :  { %vm103_vm7 = vcmp.eq.f32.partialorder %v77_v53, 0.0 }
  0xb0   :  { %144 = vrsqrt.f32 %v84_v55  ;;  %vm108_vm8 = vcmp.eq.f32.partialorder %v84_v55, inf  ;;  %v111_v8 = vand.u32 2147483648, %v84_v55  ;;  %vm110_vm10 = vcmp.eq.f32.partialorder %v84_v55, 0.0 }
  0xb4   :  { %v139_v56 = vpop.eup %138 }
  0xb5   :  { %v86_v57 = vmul.f32 %v139_v56, %v63_v46 }
  0xb6   :  { %v141_v58 = vpop.eup %140 }
  0xb7   :  { %v93_v59 = vmul.f32 %v141_v58, %v70_v50  ;;  %v88_v61 = vsel %vm87_vm1, %v63_v46, %v86_v57 }
  0xb8   :  { %v143_v60 = vpop.eup %142  ;;  %v91_v6 = vsel %vm89_vm4, %v90_v62, %v88_v61 }
  0xb9   :  { %v100_v63 = vmul.f32 %v143_v60, %v77_v53  ;;  %v95_v3 = vsel %vm94_vm5, %v70_v50, %v93_v59 }
  0xba   :  { %v145_v0 = vpop.eup %144  ;;  %v98_v11 = vsel %vm96_vm9, %v97_v1, %v95_v3 }
  0xbb   :  { %v102_v4 = vsel %vm101_vm6, %v77_v53, %v100_v63  ;;  %v107_v5 = vmul.f32 %v145_v0, %v84_v55 }
  0xbc   :  { %v105_v7 = vsel %vm103_vm7, %v104_v2, %v102_v4 }
  0xbd   :  { %v109_v9 = vsel %vm108_vm8, %v84_v55, %v107_v5  ;;  %v118_v10 = vsel %vm117_vm2, %v105_v7, %v91_v6 }
  0xbe   :  { %v112_v12 = vsel %vm110_vm10, %v111_v8, %v109_v9  ;;  %v123_v14 = vsel %vm122_vm3, %v118_v10, 0.0 }
  0xbf   :  { %v119_v13 = vsel %vm117_vm2, %v112_v12, %v98_v11 }
  0xc0   :  { %v124_v15 = vsel %vm122_vm3, %v119_v13, 0.0 }
  0xc1   :  { %v125_v16 = vadd.f32 %v124_v15, %v123_v14 }
  0xc3   :  { %126 = vadd.xlane.f32.xlu1 %v125_v16 }
 0x150   :  { %v127_v17 = vpop.xlane.xlu1 %126 }
 0x151   :  { %v128_v18 = vmul.f32 0.00390625, %v127_v17 }
 0x153   :  { %130 = vst.msk [vmem:[%s179_s1] sm:$0x3] %vm129_vm11, %v128_v18 }

</bundles_post_ra>
